<compile_context>
chip_gen: v7x
topology: tpu7x:2x2x1
jax: 0.10.0
libtpu: 0.0.40
codegen_flags: <defaults>
</compile_context>

<pallas_src>
import functools

import jax
import jax.numpy as jnp
from jax.experimental import pallas as pl
from jax.experimental.pallas import tpu as pltpu


def _rnn2_kernel(T, BB,
                 x_ref,                      # (T*BB, 9)  row t*BB+b = board(seq b, step t)
                 w1a_ref, w1b_ref, b1_ref,   # i2h1 split: (9,I), (H,I), (1,I)
                 w2_ref, b2_ref,             # h12c:       (I,H), (1,H)
                 w3_ref, b3_ref,             # c2h2:       (H,I), (1,I)
                 w4o_ref, b4o_ref,           # h22o[:9]:   (I,9), (1,9)
                 w4h_ref, b4h_ref,           # h22o[9:]:   (I,H), (1,H)
                 o_ref,                      # (T*BB, 9)  row t*BB+b = emit(seq b, step t)
                 x2_scr):                    # VMEM scratch (T*BB, I)
    f32 = jnp.float32
    H = w2_ref.shape[1]

    w1a = w1a_ref[...]; w1b = w1b_ref[...]; b1 = b1_ref[...]
    w2 = w2_ref[...];   b2 = b2_ref[...]
    w3 = w3_ref[...];   b3 = b3_ref[...]
    w4o = w4o_ref[...]; b4o = b4o_ref[...]
    w4h = w4h_ref[...]; b4h = b4h_ref[...]

    # ---- hoisted board projection: off the recurrence critical path ----
    xproj = jnp.dot(x_ref[...], w1a, preferred_element_type=f32) + b1   # (T*BB, I)

    # ---- encoder recurrence (BB sequences per step, 2 serial matmuls/step) ----
    h = jnp.zeros((BB, H), f32)
    for t in range(T):                       # T is compile-time; static unroll
        pre = xproj[t * BB:(t + 1) * BB, :] + jnp.dot(h, w1b, preferred_element_type=f32)
        h1 = jnp.maximum(pre, 0.0)           # relu
        h = jnp.dot(h1, w2, preferred_element_type=f32) + b2   # no relu (matches torch)

    # ---- decoder recurrence: stash x2, defer the output projection ----
    h2 = h
    for t in range(T):
        x2 = jnp.maximum(jnp.dot(h2, w3, preferred_element_type=f32) + b3, 0.0)
        x2_scr[t * BB:(t + 1) * BB, :] = x2
        h2 = jnp.dot(x2, w4h, preferred_element_type=f32) + b4h

    # One batched output projection + one dense store for all T steps.
    o_ref[...] = jnp.dot(x2_scr[...], w4o, preferred_element_type=f32) + b4o


def rnn2_forward(x, kernel_params, *, block_batch=8):
    """x: (B, 9*T) float32, each row an independent game history.

    Returns (B, 9*T) float32 (per-row semantics identical to the batch-1
    PyTorch module)."""
    B, total = x.shape
    assert total % 9 == 0, "RNN2 expects input width 9*T"
    T = total // 9
    BB = block_batch

    # Pad batch up to a multiple of the per-grid-step block.
    Bp = ((B + BB - 1) // BB) * BB
    if Bp != B:
        x = jnp.pad(x, ((0, Bp - B), (0, 0)))
    NB = Bp // BB

    # Host-side relayout: block nb holds rows (t*BB + bb) = board of sequence
    # nb*BB + bb at timestep t (time-major inside each batch block).
    x_rows = (x.reshape(NB, BB, T, 9)
               .transpose(0, 2, 1, 3)
               .reshape(NB, T * BB, 9))

    (w1a, w1b, b1, w2, b2, w3, b3, w4o, b4o, w4h, b4h) = kernel_params
    I = w1a.shape[1]

    def full_spec(arr):  # whole-array, VMEM-resident, same block every grid step
        return pl.BlockSpec(arr.shape, lambda i: (0, 0))

    in_specs = ([pl.BlockSpec((None, T * BB, 9), lambda i: (i, 0, 0))]
                + [full_spec(w) for w in kernel_params])
    out_spec = pl.BlockSpec((None, T * BB, 9), lambda i: (i, 0, 0))

    out = pl.pallas_call(
        functools.partial(_rnn2_kernel, T, BB),
        out_shape=jax.ShapeDtypeStruct((NB, T * BB, 9), jnp.float32),
        grid=(NB,),
        in_specs=in_specs,
        out_specs=out_spec,
        scratch_shapes=[pltpu.VMEM((T * BB, I), jnp.float32)],
        compiler_params=pltpu.CompilerParams(
            dimension_semantics=("parallel",)),   # shard batch blocks across TCs (v7x)
    )(x_rows, *kernel_params)

    # Inverse relayout back to (B, 9*T).
    out = (out.reshape(NB, T, BB, 9)
              .transpose(0, 2, 1, 3)
              .reshape(Bp, T * 9))
    return out[:B]


def init_params(key, hidden_size, inter_size):
    """Deterministic PyTorch-style (uniform +-1/sqrt(fan_in)) init."""
    def linear(k, fan_in, fan_out):
        kw, kb = jax.random.split(k)
        bound = 1.0 / (fan_in ** 0.5)
        w = jax.random.uniform(kw, (fan_in, fan_out), jnp.float32, -bound, bound)
        b = jax.random.uniform(kb, (1, fan_out), jnp.float32, -bound, bound)
        return w, b

    H, I = hidden_size, inter_size
    k1, k2, k3, k4 = jax.random.split(key, 4)
    w1, b1 = linear(k1, 9 + H, I)   # i2h1
    w2, b2 = linear(k2, I, H)       # h12c
    w3, b3 = linear(k3, H, I)       # c2h2
    w4, b4 = linear(k4, I, 9 + H)   # h22o

    kernel_params = (w1[:9, :], w1[9:, :], b1,
                     w2, b2,
                     w3, b3,
                     w4[:, :9], b4[:, :9],
                     w4[:, 9:], b4[:, 9:])
    full_params = (w1, b1, w2, b2, w3, b3, w4, b4)
    return kernel_params, full_params


def rnn2_reference(x, full_params, hidden_size):
    """Pure-JAX transcription of the PyTorch forward, vectorized over rows
    (each row gets its own zero-initialized hidden state)."""
    w1, b1, w2, b2, w3, b3, w4, b4 = full_params
    B = x.shape[0]
    T = x.shape[1] // 9
    h = jnp.zeros((B, hidden_size), jnp.float32)
    for t in range(T):
        chunk = x[:, t * 9:(t + 1) * 9]
        cur = jnp.concatenate([chunk, h], axis=1)
        h1 = jnp.maximum(cur @ w1 + b1, 0.0)
        h = h1 @ w2 + b2
    outs = []
    h2 = h
    for _ in range(T):
        x2 = jnp.maximum(h2 @ w3 + b3, 0.0)
        y = x2 @ w4 + b4
        outs.append(y[:, :9])
        h2 = y[:, 9:]
    return jnp.concatenate(outs, axis=1)


if __name__ == "__main__":
    HIDDEN = 32
    INTER = 32
    T = 8                        # 8 moves -> each sequence is (1, 72)
    BATCH = 16                   # 16 independent games, 2 grid steps of 8

    key = jax.random.PRNGKey(0)
    k_params, k_x = jax.random.split(key)
    kernel_params, full_params = init_params(k_params, HIDDEN, INTER)

    # Board-like inputs: values in {-1, 0, 1}, shape (B, 9*T).
    x = jax.random.randint(k_x, (BATCH, 9 * T), -1, 2).astype(jnp.float32)

    out = rnn2_forward(x, kernel_params)
    out = jax.block_until_ready(out)

    ref = rnn2_reference(x, full_params, HIDDEN)
    assert out.shape == x.shape, (out.shape, x.shape)
    # Slightly looser tolerance: hoisted bias add / split matmuls reassociate FP sums.
    assert jnp.allclose(out, ref, rtol=1e-4, atol=1e-4), "Pallas kernel mismatch vs reference"

    print("KERNEL_OK")
</pallas_src>

<mosaic_0001>
module attributes {stable_mosaic.version = 11 : i64} {
  func.func @_rnn2_kernel(%arg0: i32, %arg1: memref<1x64x9xf32, #tpu.memory_space<vmem>>, %arg2: memref<9x32xf32, #tpu.memory_space<vmem>>, %arg3: memref<32x32xf32, #tpu.memory_space<vmem>>, %arg4: memref<1x32xf32, #tpu.memory_space<vmem>>, %arg5: memref<32x32xf32, #tpu.memory_space<vmem>>, %arg6: memref<1x32xf32, #tpu.memory_space<vmem>>, %arg7: memref<32x32xf32, #tpu.memory_space<vmem>>, %arg8: memref<1x32xf32, #tpu.memory_space<vmem>>, %arg9: memref<32x9xf32, #tpu.memory_space<vmem>>, %arg10: memref<1x9xf32, #tpu.memory_space<vmem>>, %arg11: memref<32x32xf32, #tpu.memory_space<vmem>>, %arg12: memref<1x32xf32, #tpu.memory_space<vmem>>, %arg13: memref<1x64x9xf32, #tpu.memory_space<vmem>>, %arg14: memref<64x32xf32, #tpu.memory_space<vmem>>) attributes {dimension_semantics = [#tpu.dimension_semantics<parallel>], iteration_bounds = array<i64: 2>, scalar_prefetch = 0 : i64, scratch_operands = 1 : i64, tpu.core_type = #tpu.core_type<tc>, window_params = [{transform_indices = @transform_0, window_bounds = array<i64: 1, 64, 9>}, {pipeline_mode = #tpu.pipeline_mode<synchronous>, transform_indices = @transform_1, window_bounds = array<i64: 9, 32>}, {pipeline_mode = #tpu.pipeline_mode<synchronous>, transform_indices = @transform_2, window_bounds = array<i64: 32, 32>}, {pipeline_mode = #tpu.pipeline_mode<synchronous>, transform_indices = @transform_3, window_bounds = array<i64: 1, 32>}, {pipeline_mode = #tpu.pipeline_mode<synchronous>, transform_indices = @transform_4, window_bounds = array<i64: 32, 32>}, {pipeline_mode = #tpu.pipeline_mode<synchronous>, transform_indices = @transform_5, window_bounds = array<i64: 1, 32>}, {pipeline_mode = #tpu.pipeline_mode<synchronous>, transform_indices = @transform_6, window_bounds = array<i64: 32, 32>}, {pipeline_mode = #tpu.pipeline_mode<synchronous>, transform_indices = @transform_7, window_bounds = array<i64: 1, 32>}, {pipeline_mode = #tpu.pipeline_mode<synchronous>, transform_indices = @transform_8, window_bounds = array<i64: 32, 9>}, {pipeline_mode = #tpu.pipeline_mode<synchronous>, transform_indices = @transform_9, window_bounds = array<i64: 1, 9>}, {pipeline_mode = #tpu.pipeline_mode<synchronous>, transform_indices = @transform_10, window_bounds = array<i64: 32, 32>}, {pipeline_mode = #tpu.pipeline_mode<synchronous>, transform_indices = @transform_11, window_bounds = array<i64: 1, 32>}, {transform_indices = @transform_12, window_bounds = array<i64: 1, 64, 9>}]} {
    %c0 = arith.constant 0 : index
    %c0_0 = arith.constant 0 : index
    %0 = vector.load %arg2[%c0, %c0_0] : memref<9x32xf32, #tpu.memory_space<vmem>>, vector<9x32xf32>
    %c0_1 = arith.constant 0 : index
    %c0_2 = arith.constant 0 : index
    %1 = vector.load %arg3[%c0_1, %c0_2] : memref<32x32xf32, #tpu.memory_space<vmem>>, vector<32x32xf32>
    %c0_3 = arith.constant 0 : index
    %c0_4 = arith.constant 0 : index
    %2 = vector.load %arg4[%c0_3, %c0_4] : memref<1x32xf32, #tpu.memory_space<vmem>>, vector<1x32xf32>
    %c0_5 = arith.constant 0 : index
    %c0_6 = arith.constant 0 : index
    %3 = vector.load %arg5[%c0_5, %c0_6] : memref<32x32xf32, #tpu.memory_space<vmem>>, vector<32x32xf32>
    %c0_7 = arith.constant 0 : index
    %c0_8 = arith.constant 0 : index
    %4 = vector.load %arg6[%c0_7, %c0_8] : memref<1x32xf32, #tpu.memory_space<vmem>>, vector<1x32xf32>
    %c0_9 = arith.constant 0 : index
    %c0_10 = arith.constant 0 : index
    %5 = vector.load %arg7[%c0_9, %c0_10] : memref<32x32xf32, #tpu.memory_space<vmem>>, vector<32x32xf32>
    %c0_11 = arith.constant 0 : index
    %c0_12 = arith.constant 0 : index
    %6 = vector.load %arg8[%c0_11, %c0_12] : memref<1x32xf32, #tpu.memory_space<vmem>>, vector<1x32xf32>
    %c0_13 = arith.constant 0 : index
    %c0_14 = arith.constant 0 : index
    %7 = vector.load %arg9[%c0_13, %c0_14] : memref<32x9xf32, #tpu.memory_space<vmem>>, vector<32x9xf32>
    %c0_15 = arith.constant 0 : index
    %c0_16 = arith.constant 0 : index
    %8 = vector.load %arg10[%c0_15, %c0_16] : memref<1x9xf32, #tpu.memory_space<vmem>>, vector<1x9xf32>
    %c0_17 = arith.constant 0 : index
    %c0_18 = arith.constant 0 : index
    %9 = vector.load %arg11[%c0_17, %c0_18] : memref<32x32xf32, #tpu.memory_space<vmem>>, vector<32x32xf32>
    %c0_19 = arith.constant 0 : index
    %c0_20 = arith.constant 0 : index
    %10 = vector.load %arg12[%c0_19, %c0_20] : memref<1x32xf32, #tpu.memory_space<vmem>>, vector<1x32xf32>
    %c0_21 = arith.constant 0 : index
    %c0_22 = arith.constant 0 : index
    %c0_23 = arith.constant 0 : index
    %11 = vector.load %arg1[%c0_21, %c0_22, %c0_23] : memref<1x64x9xf32, #tpu.memory_space<vmem>>, vector<1x64x9xf32>
    %12 = vector.shape_cast %11 : vector<1x64x9xf32> to vector<64x9xf32>
    %cst = arith.constant dense<0.000000e+00> : vector<64x32xf32>
    %13 = tpu.matmul %12, %0, %cst {dimension_numbers = #tpu.dot_dimension_numbers<[1], [0], [0], [1], [0, 0, 1, 1], [], []>} : vector<64x9xf32>, vector<9x32xf32>, vector<64x32xf32> -> vector<64x32xf32>
    %14 = vector.broadcast %2 : vector<1x32xf32> to vector<64x32xf32>
    %15 = arith.addf %13, %14 : vector<64x32xf32>
    %cst_24 = arith.constant 0.000000e+00 : f32
    %16 = vector.broadcast %cst_24 : f32 to vector<8x32xf32>
    %17 = vector.extract_strided_slice %15 {offsets = [0, 0], sizes = [8, 32], strides = [1, 1]} : vector<64x32xf32> to vector<8x32xf32>
    %cst_25 = arith.constant dense<0.000000e+00> : vector<8x32xf32>
    %18 = tpu.matmul %16, %1, %cst_25 {dimension_numbers = #tpu.dot_dimension_numbers<[1], [0], [0], [1], [0, 0, 1, 1], [], []>} : vector<8x32xf32>, vector<32x32xf32>, vector<8x32xf32> -> vector<8x32xf32>
    %19 = arith.addf %17, %18 : vector<8x32xf32>
    %cst_26 = arith.constant 0.000000e+00 : f32
    %20 = vector.broadcast %cst_26 : f32 to vector<8x32xf32>
    %21 = arith.maximumf %19, %20 : vector<8x32xf32>
    %cst_27 = arith.constant dense<0.000000e+00> : vector<8x32xf32>
    %22 = tpu.matmul %21, %3, %cst_27 {dimension_numbers = #tpu.dot_dimension_numbers<[1], [0], [0], [1], [0, 0, 1, 1], [], []>} : vector<8x32xf32>, vector<32x32xf32>, vector<8x32xf32> -> vector<8x32xf32>
    %23 = vector.broadcast %4 : vector<1x32xf32> to vector<8x32xf32>
    %24 = arith.addf %22, %23 : vector<8x32xf32>
    %25 = vector.extract_strided_slice %15 {offsets = [8, 0], sizes = [8, 32], strides = [1, 1]} : vector<64x32xf32> to vector<8x32xf32>
    %cst_28 = arith.constant dense<0.000000e+00> : vector<8x32xf32>
    %26 = tpu.matmul %24, %1, %cst_28 {dimension_numbers = #tpu.dot_dimension_numbers<[1], [0], [0], [1], [0, 0, 1, 1], [], []>} : vector<8x32xf32>, vector<32x32xf32>, vector<8x32xf32> -> vector<8x32xf32>
    %27 = arith.addf %25, %26 : vector<8x32xf32>
    %cst_29 = arith.constant 0.000000e+00 : f32
    %28 = vector.broadcast %cst_29 : f32 to vector<8x32xf32>
    %29 = arith.maximumf %27, %28 : vector<8x32xf32>
    %cst_30 = arith.constant dense<0.000000e+00> : vector<8x32xf32>
    %30 = tpu.matmul %29, %3, %cst_30 {dimension_numbers = #tpu.dot_dimension_numbers<[1], [0], [0], [1], [0, 0, 1, 1], [], []>} : vector<8x32xf32>, vector<32x32xf32>, vector<8x32xf32> -> vector<8x32xf32>
    %31 = vector.broadcast %4 : vector<1x32xf32> to vector<8x32xf32>
    %32 = arith.addf %30, %31 : vector<8x32xf32>
    %33 = vector.extract_strided_slice %15 {offsets = [16, 0], sizes = [8, 32], strides = [1, 1]} : vector<64x32xf32> to vector<8x32xf32>
    %cst_31 = arith.constant dense<0.000000e+00> : vector<8x32xf32>
    %34 = tpu.matmul %32, %1, %cst_31 {dimension_numbers = #tpu.dot_dimension_numbers<[1], [0], [0], [1], [0, 0, 1, 1], [], []>} : vector<8x32xf32>, vector<32x32xf32>, vector<8x32xf32> -> vector<8x32xf32>
    %35 = arith.addf %33, %34 : vector<8x32xf32>
    %cst_32 = arith.constant 0.000000e+00 : f32
    %36 = vector.broadcast %cst_32 : f32 to vector<8x32xf32>
    %37 = arith.maximumf %35, %36 : vector<8x32xf32>
    %cst_33 = arith.constant dense<0.000000e+00> : vector<8x32xf32>
    %38 = tpu.matmul %37, %3, %cst_33 {dimension_numbers = #tpu.dot_dimension_numbers<[1], [0], [0], [1], [0, 0, 1, 1], [], []>} : vector<8x32xf32>, vector<32x32xf32>, vector<8x32xf32> -> vector<8x32xf32>
    %39 = vector.broadcast %4 : vector<1x32xf32> to vector<8x32xf32>
    %40 = arith.addf %38, %39 : vector<8x32xf32>
    %41 = vector.extract_strided_slice %15 {offsets = [24, 0], sizes = [8, 32], strides = [1, 1]} : vector<64x32xf32> to vector<8x32xf32>
    %cst_34 = arith.constant dense<0.000000e+00> : vector<8x32xf32>
    %42 = tpu.matmul %40, %1, %cst_34 {dimension_numbers = #tpu.dot_dimension_numbers<[1], [0], [0], [1], [0, 0, 1, 1], [], []>} : vector<8x32xf32>, vector<32x32xf32>, vector<8x32xf32> -> vector<8x32xf32>
    %43 = arith.addf %41, %42 : vector<8x32xf32>
    %cst_35 = arith.constant 0.000000e+00 : f32
    %44 = vector.broadcast %cst_35 : f32 to vector<8x32xf32>
    %45 = arith.maximumf %43, %44 : vector<8x32xf32>
    %cst_36 = arith.constant dense<0.000000e+00> : vector<8x32xf32>
    %46 = tpu.matmul %45, %3, %cst_36 {dimension_numbers = #tpu.dot_dimension_numbers<[1], [0], [0], [1], [0, 0, 1, 1], [], []>} : vector<8x32xf32>, vector<32x32xf32>, vector<8x32xf32> -> vector<8x32xf32>
    %47 = vector.broadcast %4 : vector<1x32xf32> to vector<8x32xf32>
    %48 = arith.addf %46, %47 : vector<8x32xf32>
    %49 = vector.extract_strided_slice %15 {offsets = [32, 0], sizes = [8, 32], strides = [1, 1]} : vector<64x32xf32> to vector<8x32xf32>
    %cst_37 = arith.constant dense<0.000000e+00> : vector<8x32xf32>
    %50 = tpu.matmul %48, %1, %cst_37 {dimension_numbers = #tpu.dot_dimension_numbers<[1], [0], [0], [1], [0, 0, 1, 1], [], []>} : vector<8x32xf32>, vector<32x32xf32>, vector<8x32xf32> -> vector<8x32xf32>
    %51 = arith.addf %49, %50 : vector<8x32xf32>
    %cst_38 = arith.constant 0.000000e+00 : f32
    %52 = vector.broadcast %cst_38 : f32 to vector<8x32xf32>
    %53 = arith.maximumf %51, %52 : vector<8x32xf32>
    %cst_39 = arith.constant dense<0.000000e+00> : vector<8x32xf32>
    %54 = tpu.matmul %53, %3, %cst_39 {dimension_numbers = #tpu.dot_dimension_numbers<[1], [0], [0], [1], [0, 0, 1, 1], [], []>} : vector<8x32xf32>, vector<32x32xf32>, vector<8x32xf32> -> vector<8x32xf32>
    %55 = vector.broadcast %4 : vector<1x32xf32> to vector<8x32xf32>
    %56 = arith.addf %54, %55 : vector<8x32xf32>
    %57 = vector.extract_strided_slice %15 {offsets = [40, 0], sizes = [8, 32], strides = [1, 1]} : vector<64x32xf32> to vector<8x32xf32>
    %cst_40 = arith.constant dense<0.000000e+00> : vector<8x32xf32>
    %58 = tpu.matmul %56, %1, %cst_40 {dimension_numbers = #tpu.dot_dimension_numbers<[1], [0], [0], [1], [0, 0, 1, 1], [], []>} : vector<8x32xf32>, vector<32x32xf32>, vector<8x32xf32> -> vector<8x32xf32>
    %59 = arith.addf %57, %58 : vector<8x32xf32>
    %cst_41 = arith.constant 0.000000e+00 : f32
    %60 = vector.broadcast %cst_41 : f32 to vector<8x32xf32>
    %61 = arith.maximumf %59, %60 : vector<8x32xf32>
    %cst_42 = arith.constant dense<0.000000e+00> : vector<8x32xf32>
    %62 = tpu.matmul %61, %3, %cst_42 {dimension_numbers = #tpu.dot_dimension_numbers<[1], [0], [0], [1], [0, 0, 1, 1], [], []>} : vector<8x32xf32>, vector<32x32xf32>, vector<8x32xf32> -> vector<8x32xf32>
    %63 = vector.broadcast %4 : vector<1x32xf32> to vector<8x32xf32>
    %64 = arith.addf %62, %63 : vector<8x32xf32>
    %65 = vector.extract_strided_slice %15 {offsets = [48, 0], sizes = [8, 32], strides = [1, 1]} : vector<64x32xf32> to vector<8x32xf32>
    %cst_43 = arith.constant dense<0.000000e+00> : vector<8x32xf32>
    %66 = tpu.matmul %64, %1, %cst_43 {dimension_numbers = #tpu.dot_dimension_numbers<[1], [0], [0], [1], [0, 0, 1, 1], [], []>} : vector<8x32xf32>, vector<32x32xf32>, vector<8x32xf32> -> vector<8x32xf32>
    %67 = arith.addf %65, %66 : vector<8x32xf32>
    %cst_44 = arith.constant 0.000000e+00 : f32
    %68 = vector.broadcast %cst_44 : f32 to vector<8x32xf32>
    %69 = arith.maximumf %67, %68 : vector<8x32xf32>
    %cst_45 = arith.constant dense<0.000000e+00> : vector<8x32xf32>
    %70 = tpu.matmul %69, %3, %cst_45 {dimension_numbers = #tpu.dot_dimension_numbers<[1], [0], [0], [1], [0, 0, 1, 1], [], []>} : vector<8x32xf32>, vector<32x32xf32>, vector<8x32xf32> -> vector<8x32xf32>
    %71 = vector.broadcast %4 : vector<1x32xf32> to vector<8x32xf32>
    %72 = arith.addf %70, %71 : vector<8x32xf32>
    %73 = vector.extract_strided_slice %15 {offsets = [56, 0], sizes = [8, 32], strides = [1, 1]} : vector<64x32xf32> to vector<8x32xf32>
    %cst_46 = arith.constant dense<0.000000e+00> : vector<8x32xf32>
    %74 = tpu.matmul %72, %1, %cst_46 {dimension_numbers = #tpu.dot_dimension_numbers<[1], [0], [0], [1], [0, 0, 1, 1], [], []>} : vector<8x32xf32>, vector<32x32xf32>, vector<8x32xf32> -> vector<8x32xf32>
    %75 = arith.addf %73, %74 : vector<8x32xf32>
    %cst_47 = arith.constant 0.000000e+00 : f32
    %76 = vector.broadcast %cst_47 : f32 to vector<8x32xf32>
    %77 = arith.maximumf %75, %76 : vector<8x32xf32>
    %cst_48 = arith.constant dense<0.000000e+00> : vector<8x32xf32>
    %78 = tpu.matmul %77, %3, %cst_48 {dimension_numbers = #tpu.dot_dimension_numbers<[1], [0], [0], [1], [0, 0, 1, 1], [], []>} : vector<8x32xf32>, vector<32x32xf32>, vector<8x32xf32> -> vector<8x32xf32>
    %79 = vector.broadcast %4 : vector<1x32xf32> to vector<8x32xf32>
    %80 = arith.addf %78, %79 : vector<8x32xf32>
    %cst_49 = arith.constant dense<0.000000e+00> : vector<8x32xf32>
    %81 = tpu.matmul %80, %5, %cst_49 {dimension_numbers = #tpu.dot_dimension_numbers<[1], [0], [0], [1], [0, 0, 1, 1], [], []>} : vector<8x32xf32>, vector<32x32xf32>, vector<8x32xf32> -> vector<8x32xf32>
    %82 = vector.broadcast %6 : vector<1x32xf32> to vector<8x32xf32>
    %83 = arith.addf %81, %82 : vector<8x32xf32>
    %cst_50 = arith.constant 0.000000e+00 : f32
    %84 = vector.broadcast %cst_50 : f32 to vector<8x32xf32>
    %85 = arith.maximumf %83, %84 : vector<8x32xf32>
    %c0_51 = arith.constant 0 : index
    %c0_52 = arith.constant 0 : index
    %86 = vector.load %arg14[%c0_51, %c0_52] : memref<64x32xf32, #tpu.memory_space<vmem>>, vector<8x32xf32>
    tpu.vector_store %arg14[%c0_51, %c0_52], %85 {strides = array<i32>} : memref<64x32xf32, #tpu.memory_space<vmem>>, vector<8x32xf32>,
    %cst_53 = arith.constant dense<0.000000e+00> : vector<8x32xf32>
    %87 = tpu.matmul %85, %9, %cst_53 {dimension_numbers = #tpu.dot_dimension_numbers<[1], [0], [0], [1], [0, 0, 1, 1], [], []>} : vector<8x32xf32>, vector<32x32xf32>, vector<8x32xf32> -> vector<8x32xf32>
    %88 = vector.broadcast %10 : vector<1x32xf32> to vector<8x32xf32>
    %89 = arith.addf %87, %88 : vector<8x32xf32>
    %cst_54 = arith.constant dense<0.000000e+00> : vector<8x32xf32>
    %90 = tpu.matmul %89, %5, %cst_54 {dimension_numbers = #tpu.dot_dimension_numbers<[1], [0], [0], [1], [0, 0, 1, 1], [], []>} : vector<8x32xf32>, vector<32x32xf32>, vector<8x32xf32> -> vector<8x32xf32>
    %91 = vector.broadcast %6 : vector<1x32xf32> to vector<8x32xf32>
    %92 = arith.addf %90, %91 : vector<8x32xf32>
    %cst_55 = arith.constant 0.000000e+00 : f32
    %93 = vector.broadcast %cst_55 : f32 to vector<8x32xf32>
    %94 = arith.maximumf %92, %93 : vector<8x32xf32>
    %c8 = arith.constant 8 : index
    %c0_56 = arith.constant 0 : index
    %95 = vector.load %arg14[%c8, %c0_56] : memref<64x32xf32, #tpu.memory_space<vmem>>, vector<8x32xf32>
    tpu.vector_store %arg14[%c8, %c0_56], %94 {strides = array<i32>} : memref<64x32xf32, #tpu.memory_space<vmem>>, vector<8x32xf32>,
    %cst_57 = arith.constant dense<0.000000e+00> : vector<8x32xf32>
    %96 = tpu.matmul %94, %9, %cst_57 {dimension_numbers = #tpu.dot_dimension_numbers<[1], [0], [0], [1], [0, 0, 1, 1], [], []>} : vector<8x32xf32>, vector<32x32xf32>, vector<8x32xf32> -> vector<8x32xf32>
    %97 = vector.broadcast %10 : vector<1x32xf32> to vector<8x32xf32>
    %98 = arith.addf %96, %97 : vector<8x32xf32>
    %cst_58 = arith.constant dense<0.000000e+00> : vector<8x32xf32>
    %99 = tpu.matmul %98, %5, %cst_58 {dimension_numbers = #tpu.dot_dimension_numbers<[1], [0], [0], [1], [0, 0, 1, 1], [], []>} : vector<8x32xf32>, vector<32x32xf32>, vector<8x32xf32> -> vector<8x32xf32>
    %100 = vector.broadcast %6 : vector<1x32xf32> to vector<8x32xf32>
    %101 = arith.addf %99, %100 : vector<8x32xf32>
    %cst_59 = arith.constant 0.000000e+00 : f32
    %102 = vector.broadcast %cst_59 : f32 to vector<8x32xf32>
    %103 = arith.maximumf %101, %102 : vector<8x32xf32>
    %c16 = arith.constant 16 : index
    %c0_60 = arith.constant 0 : index
    %104 = vector.load %arg14[%c16, %c0_60] : memref<64x32xf32, #tpu.memory_space<vmem>>, vector<8x32xf32>
    tpu.vector_store %arg14[%c16, %c0_60], %103 {strides = array<i32>} : memref<64x32xf32, #tpu.memory_space<vmem>>, vector<8x32xf32>,
    %cst_61 = arith.constant dense<0.000000e+00> : vector<8x32xf32>
    %105 = tpu.matmul %103, %9, %cst_61 {dimension_numbers = #tpu.dot_dimension_numbers<[1], [0], [0], [1], [0, 0, 1, 1], [], []>} : vector<8x32xf32>, vector<32x32xf32>, vector<8x32xf32> -> vector<8x32xf32>
    %106 = vector.broadcast %10 : vector<1x32xf32> to vector<8x32xf32>
    %107 = arith.addf %105, %106 : vector<8x32xf32>
    %cst_62 = arith.constant dense<0.000000e+00> : vector<8x32xf32>
    %108 = tpu.matmul %107, %5, %cst_62 {dimension_numbers = #tpu.dot_dimension_numbers<[1], [0], [0], [1], [0, 0, 1, 1], [], []>} : vector<8x32xf32>, vector<32x32xf32>, vector<8x32xf32> -> vector<8x32xf32>
    %109 = vector.broadcast %6 : vector<1x32xf32> to vector<8x32xf32>
    %110 = arith.addf %108, %109 : vector<8x32xf32>
    %cst_63 = arith.constant 0.000000e+00 : f32
    %111 = vector.broadcast %cst_63 : f32 to vector<8x32xf32>
    %112 = arith.maximumf %110, %111 : vector<8x32xf32>
    %c24 = arith.constant 24 : index
    %c0_64 = arith.constant 0 : index
    %113 = vector.load %arg14[%c24, %c0_64] : memref<64x32xf32, #tpu.memory_space<vmem>>, vector<8x32xf32>
    tpu.vector_store %arg14[%c24, %c0_64], %112 {strides = array<i32>} : memref<64x32xf32, #tpu.memory_space<vmem>>, vector<8x32xf32>,
    %cst_65 = arith.constant dense<0.000000e+00> : vector<8x32xf32>
    %114 = tpu.matmul %112, %9, %cst_65 {dimension_numbers = #tpu.dot_dimension_numbers<[1], [0], [0], [1], [0, 0, 1, 1], [], []>} : vector<8x32xf32>, vector<32x32xf32>, vector<8x32xf32> -> vector<8x32xf32>
    %115 = vector.broadcast %10 : vector<1x32xf32> to vector<8x32xf32>
    %116 = arith.addf %114, %115 : vector<8x32xf32>
    %cst_66 = arith.constant dense<0.000000e+00> : vector<8x32xf32>
    %117 = tpu.matmul %116, %5, %cst_66 {dimension_numbers = #tpu.dot_dimension_numbers<[1], [0], [0], [1], [0, 0, 1, 1], [], []>} : vector<8x32xf32>, vector<32x32xf32>, vector<8x32xf32> -> vector<8x32xf32>
    %118 = vector.broadcast %6 : vector<1x32xf32> to vector<8x32xf32>
    %119 = arith.addf %117, %118 : vector<8x32xf32>
    %cst_67 = arith.constant 0.000000e+00 : f32
    %120 = vector.broadcast %cst_67 : f32 to vector<8x32xf32>
    %121 = arith.maximumf %119, %120 : vector<8x32xf32>
    %c32 = arith.constant 32 : index
    %c0_68 = arith.constant 0 : index
    %122 = vector.load %arg14[%c32, %c0_68] : memref<64x32xf32, #tpu.memory_space<vmem>>, vector<8x32xf32>
    tpu.vector_store %arg14[%c32, %c0_68], %121 {strides = array<i32>} : memref<64x32xf32, #tpu.memory_space<vmem>>, vector<8x32xf32>,
    %cst_69 = arith.constant dense<0.000000e+00> : vector<8x32xf32>
    %123 = tpu.matmul %121, %9, %cst_69 {dimension_numbers = #tpu.dot_dimension_numbers<[1], [0], [0], [1], [0, 0, 1, 1], [], []>} : vector<8x32xf32>, vector<32x32xf32>, vector<8x32xf32> -> vector<8x32xf32>
    %124 = vector.broadcast %10 : vector<1x32xf32> to vector<8x32xf32>
    %125 = arith.addf %123, %124 : vector<8x32xf32>
    %cst_70 = arith.constant dense<0.000000e+00> : vector<8x32xf32>
    %126 = tpu.matmul %125, %5, %cst_70 {dimension_numbers = #tpu.dot_dimension_numbers<[1], [0], [0], [1], [0, 0, 1, 1], [], []>} : vector<8x32xf32>, vector<32x32xf32>, vector<8x32xf32> -> vector<8x32xf32>
    %127 = vector.broadcast %6 : vector<1x32xf32> to vector<8x32xf32>
    %128 = arith.addf %126, %127 : vector<8x32xf32>
    %cst_71 = arith.constant 0.000000e+00 : f32
    %129 = vector.broadcast %cst_71 : f32 to vector<8x32xf32>
    %130 = arith.maximumf %128, %129 : vector<8x32xf32>
    %c40 = arith.constant 40 : index
    %c0_72 = arith.constant 0 : index
    %131 = vector.load %arg14[%c40, %c0_72] : memref<64x32xf32, #tpu.memory_space<vmem>>, vector<8x32xf32>
    tpu.vector_store %arg14[%c40, %c0_72], %130 {strides = array<i32>} : memref<64x32xf32, #tpu.memory_space<vmem>>, vector<8x32xf32>,
    %cst_73 = arith.constant dense<0.000000e+00> : vector<8x32xf32>
    %132 = tpu.matmul %130, %9, %cst_73 {dimension_numbers = #tpu.dot_dimension_numbers<[1], [0], [0], [1], [0, 0, 1, 1], [], []>} : vector<8x32xf32>, vector<32x32xf32>, vector<8x32xf32> -> vector<8x32xf32>
    %133 = vector.broadcast %10 : vector<1x32xf32> to vector<8x32xf32>
    %134 = arith.addf %132, %133 : vector<8x32xf32>
    %cst_74 = arith.constant dense<0.000000e+00> : vector<8x32xf32>
    %135 = tpu.matmul %134, %5, %cst_74 {dimension_numbers = #tpu.dot_dimension_numbers<[1], [0], [0], [1], [0, 0, 1, 1], [], []>} : vector<8x32xf32>, vector<32x32xf32>, vector<8x32xf32> -> vector<8x32xf32>
    %136 = vector.broadcast %6 : vector<1x32xf32> to vector<8x32xf32>
    %137 = arith.addf %135, %136 : vector<8x32xf32>
    %cst_75 = arith.constant 0.000000e+00 : f32
    %138 = vector.broadcast %cst_75 : f32 to vector<8x32xf32>
    %139 = arith.maximumf %137, %138 : vector<8x32xf32>
    %c48 = arith.constant 48 : index
    %c0_76 = arith.constant 0 : index
    %140 = vector.load %arg14[%c48, %c0_76] : memref<64x32xf32, #tpu.memory_space<vmem>>, vector<8x32xf32>
    tpu.vector_store %arg14[%c48, %c0_76], %139 {strides = array<i32>} : memref<64x32xf32, #tpu.memory_space<vmem>>, vector<8x32xf32>,
    %cst_77 = arith.constant dense<0.000000e+00> : vector<8x32xf32>
    %141 = tpu.matmul %139, %9, %cst_77 {dimension_numbers = #tpu.dot_dimension_numbers<[1], [0], [0], [1], [0, 0, 1, 1], [], []>} : vector<8x32xf32>, vector<32x32xf32>, vector<8x32xf32> -> vector<8x32xf32>
    %142 = vector.broadcast %10 : vector<1x32xf32> to vector<8x32xf32>
    %143 = arith.addf %141, %142 : vector<8x32xf32>
    %cst_78 = arith.constant dense<0.000000e+00> : vector<8x32xf32>
    %144 = tpu.matmul %143, %5, %cst_78 {dimension_numbers = #tpu.dot_dimension_numbers<[1], [0], [0], [1], [0, 0, 1, 1], [], []>} : vector<8x32xf32>, vector<32x32xf32>, vector<8x32xf32> -> vector<8x32xf32>
    %145 = vector.broadcast %6 : vector<1x32xf32> to vector<8x32xf32>
    %146 = arith.addf %144, %145 : vector<8x32xf32>
    %cst_79 = arith.constant 0.000000e+00 : f32
    %147 = vector.broadcast %cst_79 : f32 to vector<8x32xf32>
    %148 = arith.maximumf %146, %147 : vector<8x32xf32>
    %c56 = arith.constant 56 : index
    %c0_80 = arith.constant 0 : index
    %149 = vector.load %arg14[%c56, %c0_80] : memref<64x32xf32, #tpu.memory_space<vmem>>, vector<8x32xf32>
    tpu.vector_store %arg14[%c56, %c0_80], %148 {strides = array<i32>} : memref<64x32xf32, #tpu.memory_space<vmem>>, vector<8x32xf32>,
    %c0_81 = arith.constant 0 : index
    %c0_82 = arith.constant 0 : index
    %150 = vector.load %arg14[%c0_81, %c0_82] : memref<64x32xf32, #tpu.memory_space<vmem>>, vector<64x32xf32>
    %cst_83 = arith.constant dense<0.000000e+00> : vector<64x9xf32>
    %151 = tpu.matmul %150, %7, %cst_83 {dimension_numbers = #tpu.dot_dimension_numbers<[1], [0], [0], [1], [0, 0, 1, 1], [], []>} : vector<64x32xf32>, vector<32x9xf32>, vector<64x9xf32> -> vector<64x9xf32>
    %152 = vector.broadcast %8 : vector<1x9xf32> to vector<64x9xf32>
    %153 = arith.addf %151, %152 : vector<64x9xf32>
    %c0_84 = arith.constant 0 : index
    %c0_85 = arith.constant 0 : index
    %c0_86 = arith.constant 0 : index
    %154 = vector.load %arg13[%c0_84, %c0_85, %c0_86] : memref<1x64x9xf32, #tpu.memory_space<vmem>>, vector<1x64x9xf32>
    %155 = vector.shape_cast %154 : vector<1x64x9xf32> to vector<64x9xf32>
    %156 = vector.shape_cast %153 : vector<64x9xf32> to vector<1x64x9xf32>
    tpu.vector_store %arg13[%c0_84, %c0_85, %c0_86], %156 {strides = array<i32>} : memref<1x64x9xf32, #tpu.memory_space<vmem>>, vector<1x64x9xf32>,
    return
  }
  func.func @transform_0(%arg0: i32) -> (i32, i32, i32) {
    %c0_i32 = arith.constant 0 : i32
    %c0_i32_0 = arith.constant 0 : i32
    %c0_i32_1 = arith.constant 0 : i32
    return %arg0, %c0_i32, %c0_i32_0 : i32, i32, i32
  }
  func.func @transform_1(%arg0: i32) -> (i32, i32) {
    %c0_i32 = arith.constant 0 : i32
    %c0_i32_0 = arith.constant 0 : i32
    %c0_i32_1 = arith.constant 0 : i32
    return %c0_i32, %c0_i32_0 : i32, i32
  }
  func.func @transform_2(%arg0: i32) -> (i32, i32) {
    %c0_i32 = arith.constant 0 : i32
    %c0_i32_0 = arith.constant 0 : i32
    %c0_i32_1 = arith.constant 0 : i32
    return %c0_i32, %c0_i32_0 : i32, i32
  }
  func.func @transform_3(%arg0: i32) -> (i32, i32) {
    %c0_i32 = arith.constant 0 : i32
    %c0_i32_0 = arith.constant 0 : i32
    %c0_i32_1 = arith.constant 0 : i32
    return %c0_i32, %c0_i32_0 : i32, i32
  }
  func.func @transform_4(%arg0: i32) -> (i32, i32) {
    %c0_i32 = arith.constant 0 : i32
    %c0_i32_0 = arith.constant 0 : i32
    %c0_i32_1 = arith.constant 0 : i32
    return %c0_i32, %c0_i32_0 : i32, i32
  }
  func.func @transform_5(%arg0: i32) -> (i32, i32) {
    %c0_i32 = arith.constant 0 : i32
    %c0_i32_0 = arith.constant 0 : i32
    %c0_i32_1 = arith.constant 0 : i32
    return %c0_i32, %c0_i32_0 : i32, i32
  }
  func.func @transform_6(%arg0: i32) -> (i32, i32) {
    %c0_i32 = arith.constant 0 : i32
    %c0_i32_0 = arith.constant 0 : i32
    %c0_i32_1 = arith.constant 0 : i32
    return %c0_i32, %c0_i32_0 : i32, i32
  }
  func.func @transform_7(%arg0: i32) -> (i32, i32) {
    %c0_i32 = arith.constant 0 : i32
    %c0_i32_0 = arith.constant 0 : i32
    %c0_i32_1 = arith.constant 0 : i32
    return %c0_i32, %c0_i32_0 : i32, i32
  }
  func.func @transform_8(%arg0: i32) -> (i32, i32) {
    %c0_i32 = arith.constant 0 : i32
    %c0_i32_0 = arith.constant 0 : i32
    %c0_i32_1 = arith.constant 0 : i32
    return %c0_i32, %c0_i32_0 : i32, i32
  }
  func.func @transform_9(%arg0: i32) -> (i32, i32) {
    %c0_i32 = arith.constant 0 : i32
    %c0_i32_0 = arith.constant 0 : i32
    %c0_i32_1 = arith.constant 0 : i32
    return %c0_i32, %c0_i32_0 : i32, i32
  }
  func.func @transform_10(%arg0: i32) -> (i32, i32) {
    %c0_i32 = arith.constant 0 : i32
    %c0_i32_0 = arith.constant 0 : i32
    %c0_i32_1 = arith.constant 0 : i32
    return %c0_i32, %c0_i32_0 : i32, i32
  }
  func.func @transform_11(%arg0: i32) -> (i32, i32) {
    %c0_i32 = arith.constant 0 : i32
    %c0_i32_0 = arith.constant 0 : i32
    %c0_i32_1 = arith.constant 0 : i32
    return %c0_i32, %c0_i32_0 : i32, i32
  }
  func.func @transform_12(%arg0: i32) -> (i32, i32, i32) {
    %c0_i32 = arith.constant 0 : i32
    %c0_i32_0 = arith.constant 0 : i32
    %c0_i32_1 = arith.constant 0 : i32
    return %arg0, %c0_i32, %c0_i32_0 : i32, i32, i32
  }
}

</mosaic_0001>

<bundles_post_ra>
// kernel: tpu_custom_call.1
= control target key start
LH: loop header
LB: loop body
LE: loop exit
PB: predicated region body
PF: predicated region fallthrough
CT: control target
= control target key end

     0   :  { %s4017_s21 = smov 0   ;;  %s4441_s0 = inlined_call_operand.vmem [shape: f32[2,64,9], index: 0, kind: input, shape index: {}]   ;;  %s4442_s1 = inlined_call_operand.vmem [shape: f32[9,32], index: 1, kind: input, shape index: {}]   ;;  %s4443_s2 = inlined_call_operand.vmem [shape: f32[32,32], index: 2, kind: input, shape index: {}]   ;;  %s4444_s3 = inlined_call_operand.vmem [shape: f32[1,32], index: 3, kind: input, shape index: {}]   ;;  %s4445_s4 = inlined_call_operand.vmem [shape: f32[32,32], index: 4, kind: input, shape index: {}]   ;;  %s4446_s5 = inlined_call_operand.vmem [shape: f32[1,32], index: 5, kind: input, shape index: {}]   ;;  %s4447_s6 = inlined_call_operand.vmem [shape: f32[32,32], index: 6, kind: input, shape index: {}]   ;;  %s4448_s7 = inlined_call_operand.vmem [shape: f32[1,32], index: 7, kind: input, shape index: {}]   ;;  %s4449_s8 = inlined_call_operand.vmem [shape: f32[32,9], index: 8, kind: input, shape index: {}]   ;;  %s4450_s9 = inlined_call_operand.vmem [shape: f32[1,9], index: 9, kind: input, shape index: {}]   ;;  %s4451_s10 = inlined_call_operand.vmem [shape: f32[32,32], index: 10, kind: input, shape index: {}]   ;;  %s4452_s11 = inlined_call_operand.vmem [shape: f32[1,32], index: 11, kind: input, shape index: {}]   ;;  %s4453_s12 = inlined_call_operand.vmem [shape: f32[2,64,9], index: 12, kind: output, shape index: {}]  }
   0x1 LB: > { %s3109_s22 = sadd.s32 4294967295, %s3946_s21   ;;  %p3113_p0 = scmp.ge.s32.totalorder %s3946_s21, 1  ;;  %s3946_s21 = sphi %s4017_s21, %s22_s21  }
   0x2   : > { %p362_p1 = scmp.lt.s32.totalorder %s3946_s21, 3 }
   0x4   : > { %p363_p2 = pnand %p3113_p0, %p362_p1 }
   0x5   : > { %v414_v0 = vld [vmem:[%s4442_s1] sm:$0xff] (!%p363_p2)  ;;  %v415_v1 = vld [vmem:[%s4442_s1 + $0x8] sm:$0x1] (!%p363_p2)  ;;  %vm480_vm0 = vcmask (!%p363_p2), 1040384   ;;  %p404_p3 = scmp.lt.s32.totalorder (!%p363_p2), %s3109_s22, 1  ;;  %vm3948_vm1 = vmmov (!%p363_p2), 1  }
   0x6   : > { %366 = sbr.rel (%p363_p2) target bundleno = 6924 (0x1b0c), region = 68  ;;  %v3728_v2 = vpack.c.bf16 (!%p363_p2), %v415_v1, %v414_v0  ;;  %vm3729_vm2 = vmpackc.low (!%p363_p2), %vm480_vm0, %vm3948_vm1  ;;  %v416_v3 = vld [vmem:[%s4443_s2] sm:$0xff] (!%p363_p2)  ;;  %v417_v4 = vld [vmem:[%s4443_s2 + $0x8] sm:$0xff] (!%p363_p2)  ;;  %v3949_v5 = vmov (!%p363_p2), 0.0|0.0   ;;  %vm3950_vm3 = vmmov (!%p363_p2), 0   ;;  %v3951_v6 = vmov (!%p363_p2), 0.0  }
   0x7   : > { %3740 = vmatprep.subr.bf16.mxu1 (!%p363_p2), %v3949_v5  ;;  %3386 = vmatprep.mubr.msk.f32.mxu1 (!%p363_p2), %vm3950_vm3, %v3951_v6  ;;  %vm455_vm4 = vcmask (!%p363_p2), 72704   ;;  %v4049_v7 = vpack.c.bf16 (!%p363_p2), %v417_v4, %v416_v3  ;;  %v418_v8 = vld [vmem:[%s4443_s2 + $0x10] sm:$0xff] (!%p363_p2)  ;;  %v419_v9 = vld [vmem:[%s4443_s2 + $0x18] sm:$0xff] (!%p363_p2)  ;;  %v421_v19 = vld [vmem:[%s4445_s4] sm:$0xff] (!%p363_p2)  ;;  %vm589_vm5 = vcmask (!%p363_p2), 261120  }
   0x8   : > { %3730 = vmatprep.subr.msk.bf16.mxu0 (!%p363_p2), %vm3729_vm2, %v3728_v2  ;;  %v4061_v14 = vpack.c.bf16 (!%p363_p2), %v419_v9, %v418_v8  ;;  %v422_v20 = vld [vmem:[%s4445_s4 + $0x8] sm:$0xff] (!%p363_p2)  ;;  %v423_v22 = vld [vmem:[%s4445_s4 + $0x10] sm:$0xff] (!%p363_p2)  ;;  %v424_v23 = vld [vmem:[%s4445_s4 + $0x18] sm:$0xff] (!%p363_p2) }
   0x9   : > { %3733 = vmatpush3.bf16.msk.msra.mxu0 (!%p363_p2), %vm3729_vm2, %v3728_v2  ;;  %v4086_v21 = vpack.c.bf16 (!%p363_p2), %v422_v20, %v421_v19  ;;  %v4096_v24 = vpack.c.bf16 (!%p363_p2), %v424_v23, %v423_v22  ;;  %v3118_v25 = vld [vmem:[%s4444_s3] ss:$0 sm:$0xff] (!%p363_p2) }
   0xa   : > { %3734 = vmatprep.subr.bf16.mxu0 (!%p363_p2), %v3949_v5  ;;  %v4123_v46 = vld [vmem:[%s4446_s5] ss:$0 sm:$0xff] (!%p363_p2) }
   0xb   : > { %3742 = vmatpush3.bf16.msra.mxu1 (!%p363_p2), %v4086_v21 }
   0xc   : > { %3743 = vmatprep.subr.bf16.mxu1 (!%p363_p2), %v3949_v5 }
   0xd   : > { %s4455_s22 = smov (!%p404_p3, %s3109_s22), 1 }
   0xe   : > { %s3172_s13 = sshll.u32 %s4455_s22, 6 }
   0xf   : > { %s408_s16 = scalar_lea.vmem %s4441_s0, %s3172_s13  ;;  %3745 = vmatpush3.bf16.msra.mxu1 %v4096_v24  ;;  %s4417_s20 = scalar_lea.vmem %s4453_s12, %s3172_s13 }
  0x10   : > { %v441_v10 = vld [vmem:[%s408_s16] sm:$0xff]  ;;  %v442_v11 = vld [vmem:[%s408_s16 + $0x8] sm:$0xff]  ;;  %v443_v12 = vld [vmem:[%s408_s16 + $0x10] sm:$0xff]  ;;  %3752 = vmatprep.subr.bf16.mxu1 %v3949_v5 }
  0x11   : > { %3355 = vmatprep.mubr.msk.f32.mxu0 %vm455_vm4, %v441_v10  ;;  %v444_v13 = vld [vmem:[%s408_s16 + $0x18] sm:$0xff]  ;;  %v445_v15 = vld [vmem:[%s408_s16 + $0x20] sm:$0xff]  ;;  %v446_v16 = vld [vmem:[%s408_s16 + $0x28] sm:$0xff] }
  0x12   : > { %3356 = vmatmul.mubr.msk.f32.vlgmr.msra.gmra.mrb[0].mxu0 %vm455_vm4, %v442_v11  ;;  %v447_v17 = vld [vmem:[%s408_s16 + $0x30] sm:$0xff]  ;;  %v448_v18 = vld [vmem:[%s408_s16 + $0x38] sm:$0xff] }
  0x13   : > { %3736 = vmatpush3.bf16.msra.mxu0 %v4049_v7  ;;  %3358 = vmatprep.mubr.msk.f32.mxu0 %vm455_vm4, %v443_v12 }
  0x14   : > { %3737 = vmatprep.subr.bf16.mxu0 %v3949_v5 }
  0x16   : > { %3359 = vmatmul.mubr.msk.f32.gmra.mrb[2].mxu0 %vm455_vm4, %v444_v13 }
  0x17   : > { %3361 = vmatprep.mubr.msk.f32.mxu0 %vm455_vm4, %v445_v15  ;;  %3739 = vmatpush3.bf16.msra.mxu0 %v4061_v14 }
  0x18   : > { %3746 = vmatprep.subr.bf16.mxu0 %v3949_v5 }
  0x1a   : > { %3362 = vmatmul.mubr.msk.f32.gmra.mrb[4].mxu0 %vm455_vm4, %v446_v16 }
  0x1b   : > { %3364 = vmatprep.mubr.msk.f32.mxu0 %vm455_vm4, %v447_v17 }
  0x1e   : > { %3365 = vmatmul.mubr.msk.f32.gmra.mrb[6].mxu0 %vm455_vm4, %v448_v18 }
  0x1f   : > { %3375 = vmatprep.mubr.msk.f32.mxu0 %vm3950_vm3, %v3951_v6 }
  0x22   : > { %3376 = vmatmul.mubr.f32.vlgmr.msra.gmra.mrb[8].mxu0 %v3951_v6 }
  0x23   : > { %3748 = vmatpush3.bf16.msra.mxu0 %v4049_v7  ;;  %3397 = vmatprep.mubr.msk.f32.mxu0 %vm3950_vm3, %v3951_v6 }
  0x24   : > { %3749 = vmatprep.subr.bf16.mxu0 %v3949_v5 }
  0x27   : > { %3751 = vmatpush3.bf16.msra.mxu0 %v4061_v14 }
  0x28   : > { %3758 = vmatprep.subr.bf16.mxu0 %v3949_v5 }
  0xe5   : > { %v3357_v26 = vpop.f32.mrb[0].mxu0 }
  0xe6   : > { %v556_v27 = vadd.f32 %v3357_v26, %v3118_v25  ;;  %v550_v28 = vpop.f32.mrb[1].mxu0 }
  0xe7   : > { %v551_v41 = vadd.f32 %v3118_v25, %v550_v28 }
  0xe9   : > { %v3360_v29 = vpop.f32.mrb[2].mxu0 }
  0xea   : > { %v4103_v30 = vadd.f32 %v3360_v29, %v3118_v25  ;;  %v560_v31 = vpop.f32.mrb[3].mxu0 }
  0xeb   : > { %v561_v32 = vadd.f32 %v3118_v25, %v560_v31 }
  0xed   : > { %v3363_v33 = vpop.f32.mrb[4].mxu0 }
  0xee   : > { %v4105_v34 = vadd.f32 %v3363_v33, %v3118_v25  ;;  %v570_v35 = vpop.f32.mrb[5].mxu0 }
  0xef   : > { %v4107_v36 = vadd.f32 %v3118_v25, %v570_v35 }
  0xf1   : > { %v3366_v37 = vpop.f32.mrb[6].mxu0 }
  0xf2   : > { %v4109_v38 = vadd.f32 %v3366_v37, %v3118_v25  ;;  %v580_v39 = vpop.f32.mrb[7].mxu0  ;;  %v428_v37 = vld [vmem:[%s4447_s6 + $0x10] sm:$0xff] }
  0xf3   : > { %v4111_v40 = vadd.f32 %v3118_v25, %v580_v39  ;;  %v429_v39 = vld [vmem:[%s4447_s6 + $0x18] sm:$0xff] }
  0xf5   : > { %v659_v42 = vpop.f32.mrb[8].mxu0 }
  0xf6   : > { %v663_v43 = vadd.f32 %v659_v42, %v551_v41  ;;  %v3377_v44 = vpop.f32.mrb[9].mxu0  ;;  %v437_v41 = vld [vmem:[%s4451_s10 + $0x8] sm:$0xff] }
  0xf8   : > { %v664_v45 = vmax.f32 %v663_v43, 0.0 }
  0xfa   : > { %3387 = vmatmul.mubr.msk.f32.vlgmr.msra.gmra.mrb[0].mxu1 %vm589_vm5, %v664_v45 }
  0xfb   : > { %3754 = vmatpush3.bf16.msra.mxu1 %v4086_v21  ;;  %3408 = vmatprep.mubr.msk.f32.mxu1 %vm3950_vm3, %v3951_v6 }
  0xfc   : > { %3755 = vmatprep.subr.bf16.mxu1 %v3949_v5 }
  0xff   : > { %3757 = vmatpush3.bf16.msra.mxu1 %v4096_v24 }
 0x100   : > { %3764 = vmatprep.subr.bf16.mxu1 %v3949_v5 }
 0x1cd   : > { %v740_v47 = vpop.f32.mrb[0].mxu1 }
 0x1ce   : > { %v741_v48 = vadd.f32 %v4123_v46, %v740_v47  ;;  %v3388_v49 = vpop.f32.mrb[1].mxu1  ;;  %v438_v47 = vld [vmem:[%s4451_s10 + $0x10] sm:$0xff] }
 0x1cf   : > { %v4278_v49 = vld [vmem:[%s4448_s7] ss:$0 sm:$0xff] }
 0x1d0   : > { %3398 = vmatmul.mubr.msk.f32.vlgmr.msra.gmra.mrb[10].mxu0 %vm589_vm5, %v741_v48 }
 0x1d1   : > { %3760 = vmatpush3.bf16.msra.mxu0 %v4049_v7  ;;  %3419 = vmatprep.mubr.msk.f32.mxu0 %vm3950_vm3, %v3951_v6 }
 0x1d2   : > { %3761 = vmatprep.subr.bf16.mxu0 %v3949_v5 }
 0x1d5   : > { %3763 = vmatpush3.bf16.msra.mxu0 %v4061_v14 }
 0x1d6   : > { %3770 = vmatprep.subr.bf16.mxu0 %v3949_v5 }
 0x2a3   : > { %v813_v50 = vpop.f32.mrb[10].mxu0 }
 0x2a4   : > { %v817_v51 = vadd.f32 %v813_v50, %v556_v27  ;;  %v3399_v52 = vpop.f32.mrb[11].mxu0 }
 0x2a6   : > { %v818_v53 = vmax.f32 %v817_v51, 0.0 }
 0x2a8   : > { %3409 = vmatmul.mubr.msk.f32.vlgmr.msra.gmra.mrb[2].mxu1 %vm589_vm5, %v818_v53 }
 0x2a9   : > { %3766 = vmatpush3.bf16.msra.mxu1 %v4086_v21  ;;  %3430 = vmatprep.mubr.msk.f32.mxu1 %vm3950_vm3, %v3951_v6 }
 0x2aa   : > { %3767 = vmatprep.subr.bf16.mxu1 %v3949_v5 }
 0x2ad   : > { %3769 = vmatpush3.bf16.msra.mxu1 %v4096_v24 }
 0x2ae   : > { %3776 = vmatprep.subr.bf16.mxu1 %v3949_v5 }
 0x37b   : > { %v888_v54 = vpop.f32.mrb[2].mxu1 }
 0x37c   : > { %v889_v55 = vadd.f32 %v4123_v46, %v888_v54  ;;  %v3410_v56 = vpop.f32.mrb[3].mxu1  ;;  %v4292_v54 = vld [vmem:[%s4452_s11] ss:$0 sm:$0xff] }
 0x37e   : > { %3420 = vmatmul.mubr.msk.f32.vlgmr.msra.gmra.mrb[12].mxu0 %vm589_vm5, %v889_v55 }
 0x37f   : > { %3772 = vmatpush3.bf16.msra.mxu0 %v4049_v7  ;;  %3441 = vmatprep.mubr.msk.f32.mxu0 %vm3950_vm3, %v3951_v6 }
 0x380   : > { %3773 = vmatprep.subr.bf16.mxu0 %v3949_v5 }
 0x383   : > { %3775 = vmatpush3.bf16.msra.mxu0 %v4061_v14 }
 0x384   : > { %3782 = vmatprep.subr.bf16.mxu0 %v3949_v5 }
 0x451   : > { %v961_v57 = vpop.f32.mrb[12].mxu0 }
 0x452   : > { %v965_v58 = vadd.f32 %v961_v57, %v561_v32  ;;  %v3421_v59 = vpop.f32.mrb[13].mxu0  ;;  %v427_v32 = vld [vmem:[%s4447_s6 + $0x8] sm:$0xff] }
 0x454   : > { %v966_v60 = vmax.f32 %v965_v58, 0.0 }
 0x456   : > { %3431 = vmatmul.mubr.msk.f32.vlgmr.msra.gmra.mrb[4].mxu1 %vm589_vm5, %v966_v60 }
 0x457   : > { %3778 = vmatpush3.bf16.msra.mxu1 %v4086_v21  ;;  %3452 = vmatprep.mubr.msk.f32.mxu1 %vm3950_vm3, %v3951_v6 }
 0x458   : > { %3779 = vmatprep.subr.bf16.mxu1 %v3949_v5 }
 0x45b   : > { %3781 = vmatpush3.bf16.msra.mxu1 %v4096_v24 }
 0x45c   : > { %3788 = vmatprep.subr.bf16.mxu1 %v3949_v5 }
 0x529   : > { %v1036_v61 = vpop.f32.mrb[4].mxu1 }
 0x52a   : > { %v1037_v62 = vadd.f32 %v4123_v46, %v1036_v61  ;;  %v3432_v63 = vpop.f32.mrb[5].mxu1 }
 0x52c   : > { %3442 = vmatmul.mubr.msk.f32.vlgmr.msra.gmra.mrb[14].mxu0 %vm589_vm5, %v1037_v62 }
 0x52d   : > { %3784 = vmatpush3.bf16.msra.mxu0 %v4049_v7  ;;  %3463 = vmatprep.mubr.msk.f32.mxu0 %vm3950_vm3, %v3951_v6 }
 0x52e   : > { %3785 = vmatprep.subr.bf16.mxu0 %v3949_v5 }
 0x531   : > { %3787 = vmatpush3.bf16.msra.mxu0 %v4061_v14 }
 0x532   : > { %3794 = vmatprep.subr.bf16.mxu0 %v3949_v5 }
 0x5ff   : > { %v1109_v0 = vpop.f32.mrb[14].mxu0 }
 0x600   : > { %v1113_v1 = vadd.f32 %v1109_v0, %v4103_v30  ;;  %v3443_v2 = vpop.f32.mrb[15].mxu0 }
 0x602   : > { %v1114_v3 = vmax.f32 %v1113_v1, 0.0 }
 0x604   : > { %3453 = vmatmul.mubr.msk.f32.vlgmr.msra.gmra.mrb[6].mxu1 %vm589_vm5, %v1114_v3 }
 0x605   : > { %3790 = vmatpush3.bf16.msra.mxu1 %v4086_v21  ;;  %3474 = vmatprep.mubr.msk.f32.mxu1 %vm3950_vm3, %v3951_v6 }
 0x606   : > { %3791 = vmatprep.subr.bf16.mxu1 %v3949_v5 }
 0x609   : > { %3793 = vmatpush3.bf16.msra.mxu1 %v4096_v24 }
 0x60a   : > { %3800 = vmatprep.subr.bf16.mxu1 %v3949_v5 }
 0x6d7   : > { %v1184_v4 = vpop.f32.mrb[6].mxu1 }
 0x6d8   : > { %v1185_v8 = vadd.f32 %v4123_v46, %v1184_v4  ;;  %v3454_v9 = vpop.f32.mrb[7].mxu1 }
 0x6da   : > { %3464 = vmatmul.mubr.msk.f32.vlgmr.msra.gmra.mrb[16].mxu0 %vm589_vm5, %v1185_v8 }
 0x6db   : > { %3796 = vmatpush3.bf16.msra.mxu0 %v4049_v7  ;;  %3485 = vmatprep.mubr.msk.f32.mxu0 %vm3950_vm3, %v3951_v6 }
 0x6dc   : > { %3797 = vmatprep.subr.bf16.mxu0 %v3949_v5 }
 0x6df   : > { %3799 = vmatpush3.bf16.msra.mxu0 %v4061_v14 }
 0x6e0   : > { %3806 = vmatprep.subr.bf16.mxu0 %v3949_v5 }
 0x7ad   : > { %v1257_v10 = vpop.f32.mrb[16].mxu0 }
 0x7ae   : > { %v1261_v11 = vadd.f32 %v1257_v10, %v4107_v36  ;;  %v3465_v12 = vpop.f32.mrb[17].mxu0 }
 0x7b0   : > { %v1262_v13 = vmax.f32 %v1261_v11, 0.0 }
 0x7b2   : > { %3475 = vmatmul.mubr.msk.f32.vlgmr.msra.gmra.mrb[8].mxu1 %vm589_vm5, %v1262_v13 }
 0x7b3   : > { %3802 = vmatpush3.bf16.msra.mxu1 %v4086_v21  ;;  %3496 = vmatprep.mubr.msk.f32.mxu1 %vm3950_vm3, %v3951_v6 }
 0x7b4   : > { %3803 = vmatprep.subr.bf16.mxu1 %v3949_v5 }
 0x7b7   : > { %3805 = vmatpush3.bf16.msra.mxu1 %v4096_v24 }
 0x7b8   : > { %3812 = vmatprep.subr.bf16.mxu1 %v3949_v5 }
 0x885   : > { %v1332_v15 = vpop.f32.mrb[8].mxu1 }
 0x886   : > { %v1333_v16 = vadd.f32 %v4123_v46, %v1332_v15  ;;  %v3476_v17 = vpop.f32.mrb[9].mxu1 }
 0x888   : > { %3486 = vmatmul.mubr.msk.f32.vlgmr.msra.gmra.mrb[18].mxu0 %vm589_vm5, %v1333_v16 }
 0x889   : > { %3808 = vmatpush3.bf16.msra.mxu0 %v4049_v7  ;;  %3507 = vmatprep.mubr.msk.f32.mxu0 %vm3950_vm3, %v3951_v6 }
 0x88a   : > { %3809 = vmatprep.subr.bf16.mxu0 %v3949_v5 }
 0x88d   : > { %3811 = vmatpush3.bf16.msra.mxu0 %v4061_v14 }
 0x88e   : > { %3818 = vmatprep.subr.bf16.mxu0 %v3949_v5 }
 0x95b   : > { %v1405_v18 = vpop.f32.mrb[18].mxu0 }
 0x95c   : > { %v1409_v19 = vadd.f32 %v1405_v18, %v4105_v34  ;;  %v3487_v20 = vpop.f32.mrb[19].mxu0 }
 0x95e   : > { %v1410_v22 = vmax.f32 %v1409_v19, 0.0 }
 0x960   : > { %3497 = vmatmul.mubr.msk.f32.vlgmr.msra.gmra.mrb[10].mxu1 %vm589_vm5, %v1410_v22 }
 0x961   : > { %3814 = vmatpush3.bf16.msra.mxu1 %v4086_v21  ;;  %3518 = vmatprep.mubr.msk.f32.mxu1 %vm3950_vm3, %v3951_v6 }
 0x962   : > { %3815 = vmatprep.subr.bf16.mxu1 %v3949_v5 }
 0x965   : > { %3817 = vmatpush3.bf16.msra.mxu1 %v4096_v24 }
 0x966   : > { %3824 = vmatprep.subr.bf16.mxu1 %v3949_v5 }
 0xa33   : > { %v1480_v23 = vpop.f32.mrb[10].mxu1 }
 0xa34   : > { %v1481_v25 = vadd.f32 %v4123_v46, %v1480_v23  ;;  %v3498_v26 = vpop.f32.mrb[11].mxu1 }
 0xa36   : > { %3508 = vmatmul.mubr.msk.f32.vlgmr.msra.gmra.mrb[20].mxu0 %vm589_vm5, %v1481_v25 }
 0xa37   : > { %3820 = vmatpush3.bf16.msra.mxu0 %v4049_v7  ;;  %3529 = vmatprep.mubr.msk.f32.mxu0 %vm3950_vm3, %v3951_v6 }
 0xa38   : > { %3821 = vmatprep.subr.bf16.mxu0 %v3949_v5 }
 0xa3b   : > { %3823 = vmatpush3.bf16.msra.mxu0 %v4061_v14 }
 0xa3c   : > { %3830 = vmatprep.subr.bf16.mxu0 %v3949_v5 }
 0xb09   : > { %v1553_v27 = vpop.f32.mrb[20].mxu0 }
 0xb0a   : > { %v1557_v28 = vadd.f32 %v1553_v27, %v4111_v40  ;;  %v3509_v29 = vpop.f32.mrb[21].mxu0  ;;  %v4243_v40 = vpack.c.bf16 %v429_v39, %v428_v37 }
 0xb0c   : > { %v1558_v30 = vmax.f32 %v1557_v28, 0.0 }
 0xb0e   : > { %3519 = vmatmul.mubr.msk.f32.vlgmr.msra.gmra.mrb[12].mxu1 %vm589_vm5, %v1558_v30 }
 0xb0f   : > { %3826 = vmatpush3.bf16.msra.mxu1 %v4086_v21  ;;  %3540 = vmatprep.mubr.msk.f32.mxu1 %vm3950_vm3, %v3951_v6  ;;  %v426_v21 = vld [vmem:[%s4447_s6] sm:$0xff] }
 0xb10   : > { %3827 = vmatprep.subr.bf16.mxu1 %v3949_v5 }
 0xb13   : > { %3829 = vmatpush3.bf16.msra.mxu1 %v4096_v24  ;;  %v4229_v24 = vpack.c.bf16 %v427_v32, %v426_v21  ;;  %v431_v32 = vld [vmem:[%s4449_s8] sm:$0xff] }
 0xb14   : > { %3836 = vmatprep.subr.bf16.mxu1 %v3949_v5 }
 0xbe1   : > { %v1628_v7 = vpop.f32.mrb[12].mxu1 }
 0xbe2   : > { %v1629_v14 = vadd.f32 %v4123_v46, %v1628_v7  ;;  %v3520_v31 = vpop.f32.mrb[13].mxu1 }
 0xbe4   : > { %3530 = vmatmul.mubr.msk.f32.vlgmr.msra.gmra.mrb[22].mxu0 %vm589_vm5, %v1629_v14 }
 0xbe5   : > { %3551 = vmatprep.mubr.msk.f32.mxu0 %vm3950_vm3, %v3951_v6  ;;  %3832 = vmatpush3.bf16.msra.mxu0 %v4229_v24 }
 0xbe6   : > { %3833 = vmatprep.subr.bf16.mxu0 %v3949_v5 }
 0xbe9   : > { %3835 = vmatpush3.bf16.msra.mxu0 %v4243_v40 }
 0xbea   : > { %3842 = vmatprep.subr.bf16.mxu0 %v3949_v5 }
 0xcb7   : > { %v1701_v33 = vpop.f32.mrb[22].mxu0 }
 0xcb8   : > { %v1705_v34 = vadd.f32 %v1701_v33, %v4109_v38  ;;  %v3531_v35 = vpop.f32.mrb[23].mxu0  ;;  %v436_v38 = vld [vmem:[%s4451_s10] sm:$0xff]  ;;  %v432_v33 = vld [vmem:[%s4449_s8 + $0x8] sm:$0xff] }
 0xcb9   : > { %v4253_v42 = vpack.c.bf16 %v437_v41, %v436_v38 }
 0xcba   : > { %v1706_v36 = vmax.f32 %v1705_v34, 0.0  ;;  %v3920_v34 = vpack.c.bf16 %v432_v33, %v431_v32 }
 0xcbc   : > { %3541 = vmatmul.mubr.msk.f32.vlgmr.msra.gmra.mrb[14].mxu1 %vm589_vm5, %v1706_v36 }
 0xcbd   : > { %3562 = vmatprep.mubr.msk.f32.mxu1 %vm3950_vm3, %v3951_v6  ;;  %3838 = vmatpush3.bf16.msra.mxu1 %v4253_v42 }
 0xcbe   : > { %3839 = vmatprep.subr.bf16.mxu1 %v3949_v5 }
 0xd8f   : > { %v1776_v43 = vpop.f32.mrb[14].mxu1 }
 0xd90   : > { %v1777_v44 = vadd.f32 %v4123_v46, %v1776_v43  ;;  %v3542_v45 = vpop.f32.mrb[15].mxu1  ;;  %v439_v46 = vld [vmem:[%s4451_s10 + $0x18] sm:$0xff] }
 0xd91   : > { %v4271_v48 = vpack.c.bf16 %v439_v46, %v438_v47 }
 0xd92   : > { %3552 = vmatmul.mubr.msk.f32.vlgmr.msra.gmra.mrb[24].mxu0 %vm589_vm5, %v1777_v44 }
 0xd93   : > { %3844 = vmatpush3.bf16.msra.mxu0 %v4229_v24  ;;  %3573 = vmatprep.mubr.msk.f32.mxu0 %vm3950_vm3, %v3951_v6 }
 0xd94   : > { %3845 = vmatprep.subr.bf16.mxu0 %v3949_v5  ;;  %3841 = vmatpush3.bf16.msra.mxu1 %v4271_v48 }
 0xd95   : > { %3848 = vmatprep.subr.bf16.mxu1 %v3949_v5 }
 0xd97   : > { %3847 = vmatpush3.bf16.msra.mxu0 %v4243_v40 }
 0xd98   : > { %3854 = vmatprep.subr.bf16.mxu0 %v3949_v5 }
 0xe65   : > { %v1855_v50 = vpop.f32.mrb[24].mxu0 }
 0xe66   : > { %v1856_v51 = vadd.f32 %v4278_v49, %v1855_v50  ;;  %v3553_v52 = vpop.f32.mrb[25].mxu0  ;;  %v3161_v50 = vld [vmem:[%s4450_s9] ss:$0 sm:$0xff] }
 0xe68   : > { %v1859_v53 = vmax.f32 %v1856_v51, 0.0 }
 0xe6a   : > { %1860 = vst.msk [vmem:[#allocation2] sm:$0xff] %vm589_vm5, %v1859_v53  ;;  %3563 = vmatmul.mubr.msk.f32.vlgmr.msra.gmra.mrb[16].mxu1 %vm589_vm5, %v1859_v53 }
 0xe6b   : > { %3850 = vmatpush3.bf16.msra.mxu1 %v4253_v42  ;;  %3584 = vmatprep.mubr.msk.f32.mxu1 %vm3950_vm3, %v3951_v6 }
 0xe6c   : > { %3851 = vmatprep.subr.bf16.mxu1 %v3949_v5 }
 0xe6f   : > { %3853 = vmatpush3.bf16.msra.mxu1 %v4271_v48 }
 0xe70   : > { %3860 = vmatprep.subr.bf16.mxu1 %v3949_v5 }
 0xf3d   : > { %v1936_v55 = vpop.f32.mrb[16].mxu1 }
 0xf3e   : > { %v1937_v56 = vadd.f32 %v4292_v54, %v1936_v55  ;;  %v3564_v57 = vpop.f32.mrb[17].mxu1 }
 0xf40   : > { %3574 = vmatmul.mubr.msk.f32.vlgmr.msra.gmra.mrb[26].mxu0 %vm589_vm5, %v1937_v56 }
 0xf41   : > { %3856 = vmatpush3.bf16.msra.mxu0 %v4229_v24  ;;  %3595 = vmatprep.mubr.msk.f32.mxu0 %vm3950_vm3, %v3951_v6 }
 0xf42   : > { %3857 = vmatprep.subr.bf16.mxu0 %v3949_v5 }
 0xf45   : > { %3859 = vmatpush3.bf16.msra.mxu0 %v4243_v40 }
 0xf46   : > { %3866 = vmatprep.subr.bf16.mxu0 %v3949_v5 }
0x1013   : > { %v2009_v58 = vpop.f32.mrb[26].mxu0 }
0x1014   : > { %v2010_v59 = vadd.f32 %v4278_v49, %v2009_v58  ;;  %v3575_v60 = vpop.f32.mrb[27].mxu0 }
0x1016   : > { %v2013_v61 = vmax.f32 %v2010_v59, 0.0 }
0x1018   : > { %2014 = vst.msk [vmem:[#allocation2 + $0x8] sm:$0xff] %vm589_vm5, %v2013_v61  ;;  %3585 = vmatmul.mubr.msk.f32.vlgmr.msra.gmra.mrb[18].mxu1 %vm589_vm5, %v2013_v61 }
0x1019   : > { %3862 = vmatpush3.bf16.msra.mxu1 %v4253_v42  ;;  %3606 = vmatprep.mubr.msk.f32.mxu1 %vm3950_vm3, %v3951_v6 }
0x101a   : > { %3863 = vmatprep.subr.bf16.mxu1 %v3949_v5 }
0x101d   : > { %3865 = vmatpush3.bf16.msra.mxu1 %v4271_v48 }
0x101e   : > { %3872 = vmatprep.subr.bf16.mxu1 %v3949_v5 }
0x101f   : > { %v2904_v38 = vld [vmem:[#allocation2 + $0x8] sm:$0xff] }
0x10eb   : > { %v2084_v62 = vpop.f32.mrb[18].mxu1 }
0x10ec   : > { %v2085_v63 = vadd.f32 %v4292_v54, %v2084_v62  ;;  %v3586_v0 = vpop.f32.mrb[19].mxu1 }
0x10ee   : > { %3596 = vmatmul.mubr.msk.f32.vlgmr.msra.gmra.mrb[28].mxu0 %vm589_vm5, %v2085_v63 }
0x10ef   : > { %3868 = vmatpush3.bf16.msra.mxu0 %v4229_v24  ;;  %3617 = vmatprep.mubr.msk.f32.mxu0 %vm3950_vm3, %v3951_v6 }
0x10f0   : > { %3869 = vmatprep.subr.bf16.mxu0 %v3949_v5 }
0x10f3   : > { %3871 = vmatpush3.bf16.msra.mxu0 %v4243_v40 }
0x10f4   : > { %3878 = vmatprep.subr.bf16.mxu0 %v3949_v5 }
0x11c1   : > { %v2157_v1 = vpop.f32.mrb[28].mxu0 }
0x11c2   : > { %v2158_v2 = vadd.f32 %v4278_v49, %v2157_v1  ;;  %v3597_v3 = vpop.f32.mrb[29].mxu0 }
0x11c4   : > { %v2161_v4 = vmax.f32 %v2158_v2, 0.0 }
0x11c6   : > { %2162 = vst.msk [vmem:[#allocation2 + $0x10] sm:$0xff] %vm589_vm5, %v2161_v4  ;;  %3607 = vmatmul.mubr.msk.f32.vlgmr.msra.gmra.mrb[20].mxu1 %vm589_vm5, %v2161_v4 }
0x11c7   : > { %3874 = vmatpush3.bf16.msra.mxu1 %v4253_v42  ;;  %3628 = vmatprep.mubr.msk.f32.mxu1 %vm3950_vm3, %v3951_v6 }
0x11c8   : > { %3875 = vmatprep.subr.bf16.mxu1 %v3949_v5 }
0x11cb   : > { %3877 = vmatpush3.bf16.msra.mxu1 %v4271_v48 }
0x11cc   : > { %3884 = vmatprep.subr.bf16.mxu1 %v3949_v5 }
0x11cd   : > { %v2905_v41 = vld [vmem:[#allocation2 + $0x10] sm:$0xff] }
0x1299   : > { %v2232_v8 = vpop.f32.mrb[20].mxu1 }
0x129a   : > { %v2233_v9 = vadd.f32 %v4292_v54, %v2232_v8  ;;  %v3608_v10 = vpop.f32.mrb[21].mxu1 }
0x129c   : > { %3618 = vmatmul.mubr.msk.f32.vlgmr.msra.gmra.mrb[30].mxu0 %vm589_vm5, %v2233_v9 }
0x129d   : > { %3880 = vmatpush3.bf16.msra.mxu0 %v4229_v24  ;;  %3639 = vmatprep.mubr.msk.f32.mxu0 %vm3950_vm3, %v3951_v6 }
0x129e   : > { %3881 = vmatprep.subr.bf16.mxu0 %v3949_v5 }
0x12a1   : > { %3883 = vmatpush3.bf16.msra.mxu0 %v4243_v40 }
0x12a2   : > { %3890 = vmatprep.subr.bf16.mxu0 %v3949_v5 }
0x136f   : > { %v2305_v11 = vpop.f32.mrb[30].mxu0 }
0x1370   : > { %v2306_v12 = vadd.f32 %v4278_v49, %v2305_v11  ;;  %v3619_v13 = vpop.f32.mrb[31].mxu0 }
0x1372   : > { %v2309_v15 = vmax.f32 %v2306_v12, 0.0 }
0x1374   : > { %2310 = vst.msk [vmem:[#allocation2 + $0x18] sm:$0xff] %vm589_vm5, %v2309_v15  ;;  %3629 = vmatmul.mubr.msk.f32.vlgmr.msra.gmra.mrb[22].mxu1 %vm589_vm5, %v2309_v15 }
0x1375   : > { %3886 = vmatpush3.bf16.msra.mxu1 %v4253_v42  ;;  %3650 = vmatprep.mubr.msk.f32.mxu1 %vm3950_vm3, %v3951_v6 }
0x1376   : > { %3887 = vmatprep.subr.bf16.mxu1 %v3949_v5 }
0x1379   : > { %3889 = vmatpush3.bf16.msra.mxu1 %v4271_v48 }
0x137a   : > { %3896 = vmatprep.subr.bf16.mxu1 %v3949_v5 }
0x1447   : > { %v2380_v16 = vpop.f32.mrb[22].mxu1 }
0x1448   : > { %v2381_v17 = vadd.f32 %v4292_v54, %v2380_v16  ;;  %v3630_v18 = vpop.f32.mrb[23].mxu1 }
0x144a   : > { %3640 = vmatmul.mubr.msk.f32.vlgmr.msra.gmra.mrb[32].mxu0 %vm589_vm5, %v2381_v17 }
0x144b   : > { %3892 = vmatpush3.bf16.msra.mxu0 %v4229_v24  ;;  %3661 = vmatprep.mubr.msk.f32.mxu0 %vm3950_vm3, %v3951_v6 }
0x144c   : > { %3893 = vmatprep.subr.bf16.mxu0 %v3949_v5 }
0x144f   : > { %3895 = vmatpush3.bf16.msra.mxu0 %v4243_v40 }
0x1450   : > { %3902 = vmatprep.subr.bf16.mxu0 %v3949_v5 }
0x151d   : > { %v2453_v19 = vpop.f32.mrb[32].mxu0 }
0x151e   : > { %v2454_v20 = vadd.f32 %v4278_v49, %v2453_v19  ;;  %v3641_v22 = vpop.f32.mrb[33].mxu0 }
0x1520   : > { %v2457_v23 = vmax.f32 %v2454_v20, 0.0 }
0x1522   : > { %2458 = vst.msk [vmem:[#allocation2 + $0x20] sm:$0xff] %vm589_vm5, %v2457_v23  ;;  %3651 = vmatmul.mubr.msk.f32.vlgmr.msra.gmra.mrb[24].mxu1 %vm589_vm5, %v2457_v23 }
0x1523   : > { %3898 = vmatpush3.bf16.msra.mxu1 %v4253_v42  ;;  %3672 = vmatprep.mubr.msk.f32.mxu1 %vm3950_vm3, %v3951_v6 }
0x1524   : > { %3899 = vmatprep.subr.bf16.mxu1 %v3949_v5 }
0x1527   : > { %3901 = vmatpush3.bf16.msra.mxu1 %v4271_v48 }
0x1528   : > { %3908 = vmatprep.subr.bf16.mxu1 %v3949_v5 }
0x1529   : > { %v2907_v43 = vld [vmem:[#allocation2 + $0x20] sm:$0xff] }
0x15f5   : > { %v2528_v25 = vpop.f32.mrb[24].mxu1 }
0x15f6   : > { %v2529_v26 = vadd.f32 %v4292_v54, %v2528_v25  ;;  %v3652_v27 = vpop.f32.mrb[25].mxu1 }
0x15f8   : > { %3662 = vmatmul.mubr.msk.f32.vlgmr.msra.gmra.mrb[34].mxu0 %vm589_vm5, %v2529_v26 }
0x15f9   : > { %3904 = vmatpush3.bf16.msra.mxu0 %v4229_v24  ;;  %3683 = vmatprep.mubr.msk.f32.mxu0 %vm3950_vm3, %v3951_v6 }
0x15fa   : > { %3905 = vmatprep.subr.bf16.mxu0 %v3949_v5 }
0x15fd   : > { %3907 = vmatpush3.bf16.msra.mxu0 %v4243_v40 }
0x15fe   : > { %3914 = vmatprep.subr.bf16.mxu0 %v3949_v5 }
0x16cb   : > { %v2601_v28 = vpop.f32.mrb[34].mxu0 }
0x16cc   : > { %v2602_v29 = vadd.f32 %v4278_v49, %v2601_v28  ;;  %v3663_v30 = vpop.f32.mrb[35].mxu0 }
0x16ce   : > { %v2605_v7 = vmax.f32 %v2602_v29, 0.0 }
0x16d0   : > { %2606 = vst.msk [vmem:[#allocation2 + $0x28] sm:$0xff] %vm589_vm5, %v2605_v7  ;;  %3673 = vmatmul.mubr.msk.f32.vlgmr.msra.gmra.mrb[26].mxu1 %vm589_vm5, %v2605_v7 }
0x16d1   : > { %3910 = vmatpush3.bf16.msra.mxu1 %v4253_v42  ;;  %3694 = vmatprep.mubr.msk.f32.mxu1 %vm3950_vm3, %v3951_v6  ;;  %v2906_v42 = vld [vmem:[#allocation2 + $0x18] sm:$0xff] }
0x16d2   : > { %3911 = vmatprep.subr.bf16.mxu1 %v3949_v5 }
0x16d5   : > { %3913 = vmatpush3.bf16.msra.mxu1 %v4271_v48 }
0x16d6   : > { %3921 = vmatprep.subr.bf16.mxu1 %v3920_v34 }
0x16d7   : > { %v2908_v44 = vld [vmem:[#allocation2 + $0x28] sm:$0xff] }
0x17a3   : > { %v2676_v14 = vpop.f32.mrb[26].mxu1 }
0x17a4   : > { %v2677_v31 = vadd.f32 %v4292_v54, %v2676_v14  ;;  %v3674_v21 = vpop.f32.mrb[27].mxu1 }
0x17a6   : > { %3684 = vmatmul.mubr.msk.f32.vlgmr.msra.gmra.mrb[36].mxu0 %vm589_vm5, %v2677_v31 }
0x17a7   : > { %3916 = vmatpush3.bf16.msra.mxu0 %v4229_v24  ;;  %3705 = vmatprep.mubr.msk.f32.mxu0 %vm3950_vm3, %v3951_v6  ;;  %v433_v24 = vld [vmem:[%s4449_s8 + $0x10] sm:$0xff] }
0x17a8   : > { %3917 = vmatprep.subr.bf16.mxu0 %v3949_v5  ;;  %v434_v5 = vld [vmem:[%s4449_s8 + $0x18] sm:$0xff] }
0x17a9   : > { %v3924_v39 = vpack.c.bf16 %v434_v5, %v433_v24 }
0x17ab   : > { %3919 = vmatpush3.bf16.msra.mxu0 %v4243_v40  ;;  %v2903_v40 = vld [vmem:[#allocation2] sm:$0xff] }
0x1879   : > { %v2749_v35 = vpop.f32.mrb[36].mxu0 }
0x187a   : > { %v2750_v6 = vadd.f32 %v4278_v49, %v2749_v35  ;;  %v3685_v36 = vpop.f32.mrb[37].mxu0 }
0x187c   : > { %v2753_v37 = vmax.f32 %v2750_v6, 0.0 }
0x187e   : > { %2754 = vst.msk [vmem:[#allocation2 + $0x30] sm:$0xff] %vm589_vm5, %v2753_v37  ;;  %3695 = vmatmul.mubr.msk.f32.vlgmr.msra.gmra.mrb[28].mxu1 %vm589_vm5, %v2753_v37 }
0x187f   : > { %3923 = vmatpush3.bf16.msra.mxu1 %v3920_v34  ;;  %3716 = vmatprep.mubr.msk.f32.mxu1 %vm589_vm5, %v2903_v40 }
0x1880   : > { %3925 = vmatprep.subr.bf16.mxu1 %v3924_v39 }
0x1883   : > { %3927 = vmatpush3.bf16.msra.mxu1 %v3924_v39 }
0x1885   : > { %v2909_v45 = vld [vmem:[#allocation2 + $0x30] sm:$0xff] }
0x1886   : > { %3717 = vmatmul.mubr.msk.f32.vlgmr.msra.gmra.mrb[30].mxu1 %vm589_vm5, %v2904_v38 }
0x1887   : > { %3719 = vmatprep.mubr.msk.f32.mxu1 %vm589_vm5, %v2905_v41 }
0x188a   : > { %3720 = vmatmul.mubr.msk.f32.gmra.mrb[32].mxu1 %vm589_vm5, %v2906_v42 }
0x188b   : > { %3722 = vmatprep.mubr.msk.f32.mxu1 %vm589_vm5, %v2907_v43 }
0x188e   : > { %3723 = vmatmul.mubr.msk.f32.gmra.mrb[34].mxu1 %vm589_vm5, %v2908_v44 }
0x188f   : > { %3725 = vmatprep.mubr.msk.f32.mxu1 %vm589_vm5, %v2909_v45 }
0x1951   : > { %v2824_v47 = vpop.f32.mrb[28].mxu1 }
0x1952   : > { %v2825_v46 = vadd.f32 %v4292_v54, %v2824_v47  ;;  %v3696_v48 = vpop.f32.mrb[29].mxu1 }
0x1954   : > { %3706 = vmatmul.mubr.msk.f32.vlgmr.msra.gmra.mrb[38].mxu0 %vm589_vm5, %v2825_v46 }
0x1959   : > { %v3718_v51 = vpop.f32.mrb[30].mxu1 }
0x195a   : > { %v3013_v52 = vadd.f32 %v3718_v51, %v3161_v50  ;;  %v3007_v53 = vpop.f32.mrb[31].mxu1 }
0x195b   : > { %v3008_v54 = vadd.f32 %v3161_v50, %v3007_v53 }
0x195c   : > { %3047 = vst.msk [vmem:[%s4417_s20 + $0x8] sm:$0xff] %vm455_vm4, %v3013_v52 }
0x195d   : > { %3046 = vst.msk [vmem:[%s4417_s20] sm:$0xff] %vm455_vm4, %v3008_v54  ;;  %v3721_v55 = vpop.f32.mrb[32].mxu1 }
0x195e   : > { %v3023_v56 = vadd.f32 %v3721_v55, %v3161_v50  ;;  %v3017_v57 = vpop.f32.mrb[33].mxu1 }
0x195f   : > { %v3018_v58 = vadd.f32 %v3161_v50, %v3017_v57 }
0x1960   : > { %3049 = vst.msk [vmem:[%s4417_s20 + $0x18] sm:$0xff] %vm455_vm4, %v3023_v56 }
0x1961   : > { %3048 = vst.msk [vmem:[%s4417_s20 + $0x10] sm:$0xff] %vm455_vm4, %v3018_v58  ;;  %v3724_v59 = vpop.f32.mrb[34].mxu1 }
0x1962   : > { %v3033_v60 = vadd.f32 %v3724_v59, %v3161_v50  ;;  %v3027_v61 = vpop.f32.mrb[35].mxu1 }
0x1963   : > { %v3028_v62 = vadd.f32 %v3161_v50, %v3027_v61 }
0x1964   : > { %3051 = vst.msk [vmem:[%s4417_s20 + $0x28] sm:$0xff] %vm455_vm4, %v3033_v60 }
0x1965   : > { %3050 = vst.msk [vmem:[%s4417_s20 + $0x20] sm:$0xff] %vm455_vm4, %v3028_v62 }
0x1a27   : > { %v2897_v63 = vpop.f32.mrb[38].mxu0 }
0x1a28   : > { %v2898_v0 = vadd.f32 %v4278_v49, %v2897_v63  ;;  %v3707_v1 = vpop.f32.mrb[39].mxu0 }
0x1a2a   : > { %v2901_v2 = vmax.f32 %v2898_v0, 0.0 }
0x1a2c   : > { %2902 = vst.msk [vmem:[#allocation2 + $0x38] sm:$0xff] %vm589_vm5, %v2901_v2 }
0x1a33   : > { %v2910_v3 = vld [vmem:[#allocation2 + $0x38] sm:$0xff] }
0x1a34   : > { %3726 = vmatmul.mubr.msk.f32.gmra.mrb[36].mxu1 %vm589_vm5, %v2910_v3 }
0x1b07   : > { %v3727_v4 = vpop.f32.mrb[36].mxu1 }
0x1b08   : > { %v3043_v8 = vadd.f32 %v3727_v4, %v3161_v50  ;;  %v3037_v9 = vpop.f32.mrb[37].mxu1 }
0x1b09   : > { %v3038_v10 = vadd.f32 %v3161_v50, %v3037_v9 }
0x1b0a   : > { %3053 = vst.msk [vmem:[%s4417_s20 + $0x38] sm:$0xff] %vm455_vm4, %v3043_v8 }
0x1b0b   : > { %3052 = vst.msk [vmem:[%s4417_s20 + $0x30] sm:$0xff] %vm455_vm4, %v3038_v10 }
0x1b0c PF: > { %s22_s21 = sadd.s32 1, %s3946_s21  }
0x1b0d   : > { %p19_p4 = scmp.ge.s32.totalorder %s22_s21, 4  }
0x1b0f   :  { %21 = sbr.rel (!%p19_p4) target bundleno = 1 (0x1), region = 98 }

</bundles_post_ra>
